<compile_context>
chip_gen: v5e
topology: v5e:2x2
jax: 0.10.0
libtpu: 0.0.40
codegen_flags: <defaults>
</compile_context>

<pallas_src>
import functools
import math

import jax
import jax.numpy as jnp
from jax.experimental import pallas as pl
from jax.experimental.pallas import tpu as pltpu


def _round_up(x, m):
    return ((x + m - 1) // m) * m


# ----------------------------- Pallas kernel --------------------------------

def _transr_kernel(e_h_ref, e_t_ref, e_r_ref, wt_ref, out_ref, *, p_norm):
    # One MXU matmul on the head-tail difference (exact by linearity):
    #   W e_h + e_r - W e_t == W (e_h - e_t) + e_r
    diff = e_h_ref[...] - e_t_ref[...]                       # VPU, cheap
    proj = jnp.dot(diff, wt_ref[...],
                   preferred_element_type=jnp.float32)       # MXU, f32 acc
    x = proj + e_r_ref[...].astype(jnp.float32)

    # ||x||_p ** p == sum(|x|^p) along the last axis (f32 throughout).
    if p_norm == 2:
        powed = x * x                                        # VPU only
    elif p_norm == 1:
        powed = jnp.abs(x)
    else:
        powed = jnp.abs(x) ** p_norm                         # EUP pow for general p
    out_ref[...] = jnp.sum(powed, axis=-1, keepdims=True)


def transr_score(e_h, e_t, e_r, wt, *, p_norm, block_b=512):
    """e_h, e_t: [B, edim]; e_r: [B, rdim]; wt: [edim, rdim] (pre-transposed W)."""
    B, edim = e_h.shape
    rdim = e_r.shape[-1]
    itemsize = jnp.dtype(e_h.dtype).itemsize

    # Pick the largest batch tile whose double-buffered working set
    # (e_h + e_t + e_r tiles + output) plus the VMEM-resident Wt stays well
    # under the default scoped-VMEM limit on every generation (16 MiB on v5e),
    # rounded down to a sublane multiple of 8.
    vmem_budget = 12 * 1024 * 1024
    row_bytes = (2 * edim + rdim + 1) * itemsize
    w_bytes = edim * rdim * itemsize
    tb_cap = max(8, ((vmem_budget - 2 * w_bytes) // (2 * row_bytes)) // 8 * 8)
    TB = int(max(8, min(block_b, tb_cap, _round_up(B, 8))))

    num_tiles = pl.cdiv(B, TB)
    Bp = num_tiles * TB
    if Bp != B:
        pad = Bp - B
        e_h = jnp.pad(e_h, ((0, pad), (0, 0)))
        e_t = jnp.pad(e_t, ((0, pad), (0, 0)))
        e_r = jnp.pad(e_r, ((0, pad), (0, 0)))

    cost = pl.CostEstimate(
        flops=2 * Bp * edim * rdim + 3 * Bp * rdim + Bp * edim,
        transcendentals=0 if p_norm in (1, 2) else Bp * rdim,
        bytes_accessed=(2 * Bp * edim + Bp * rdim + edim * rdim) * itemsize
                       + Bp * 4,
    )

    kernel = functools.partial(_transr_kernel, p_norm=p_norm)
    out = pl.pallas_call(
        kernel,
        out_shape=jax.ShapeDtypeStruct((Bp, 1), jnp.float32),
        grid=(num_tiles,),
        in_specs=[
            pl.BlockSpec((TB, edim), lambda i: (i, 0)),     # e_h tile (double-buffered)
            pl.BlockSpec((TB, edim), lambda i: (i, 0)),     # e_t tile
            pl.BlockSpec((TB, rdim), lambda i: (i, 0)),     # e_r tile
            pl.BlockSpec((edim, rdim), lambda i: (0, 0)),   # Wt resident (DMA'd once)
        ],
        out_specs=pl.BlockSpec((TB, 1), lambda i: (i, 0)),
        compiler_params=pltpu.CompilerParams(
            # Batch tiles are independent (no cross-step accumulator): lets the
            # grid shard across TensorCores on v7x and pipeline DMAs freely.
            dimension_semantics=("parallel",)),
        cost_estimate=cost,
    )(e_h, e_t, e_r, wt)
    return out[:B, 0]  # [B]


# --------------------------- Parameter construction --------------------------

def xavier_uniform(key, shape, dtype=jnp.float32):
    fan_in, fan_out = shape[1], shape[0]
    bound = math.sqrt(6.0 / (fan_in + fan_out))
    return jax.random.uniform(key, shape, dtype, minval=-bound, maxval=bound)


class TransRParams:
    def __init__(self, key, nentity, nrelation, edim, rdim, p_norm):
        assert rdim == nrelation, (
            "reference module sets emb_rel.weight = diag(ones(nrelation)), "
            "so relation embedding dim == nrelation")
        k1, k2, k3 = jax.random.split(key, 3)
        # nn.Embedding weights, xavier-uniform initialized (module.init()).
        self.emb_e = xavier_uniform(k1, (nentity, edim))
        self.emb_rel = xavier_uniform(k2, (nrelation, rdim))
        # nn.Linear(edim, rdim, bias=False) weight is (rdim, edim); store it
        # pre-transposed once so no per-call HBM transpose is needed.
        bound = 1.0 / math.sqrt(edim)
        w = jax.random.uniform(
            k3, (rdim, edim), jnp.float32, minval=-bound, maxval=bound)
        self.wt = w.T  # [edim, rdim]
        self.p_norm = p_norm


@functools.partial(jax.jit, static_argnames=("p_norm", "block_b"))
def transr_forward(emb_e, emb_rel, wt, h, rel, t, *, p_norm, block_b=512):
    # Embedding lookups (plain JAX gathers, scheduled by jit around the kernel).
    # TODO(synk): fuse these gathers into the kernel (scalar-prefetched indices
    # + per-row DMA from the HBM tables) to remove the extra HBM round trip of
    # the gathered activations.
    e_h = jnp.take(emb_e, h, axis=0)
    e_r = jnp.take(emb_rel, rel, axis=0)
    e_t = jnp.take(emb_e, t, axis=0)
    return transr_score(e_h, e_t, e_r, wt, p_norm=p_norm, block_b=block_b)


# ---------------------------------- main -------------------------------------

if __name__ == "__main__":
    key = jax.random.PRNGKey(0)
    kp, kh, kr, kt = jax.random.split(key, 4)

    # Small synthetic config (batch chosen so the grid has >1 tile and
    # exercises the padding path: 12 rows, tile 8 -> 2 tiles of 8, padded).
    nentity, nrelation, edim, rdim, p_norm = 64, 16, 32, 16, 2
    batch = 12

    params = TransRParams(kp, nentity, nrelation, edim, rdim, p_norm)

    h = jax.random.randint(kh, (batch,), 0, nentity, dtype=jnp.int32)
    rel = jax.random.randint(kr, (batch,), 0, nrelation, dtype=jnp.int32)
    t = jax.random.randint(kt, (batch,), 0, nentity, dtype=jnp.int32)

    scores = transr_forward(params.emb_e, params.emb_rel, params.wt,
                            h, rel, t, p_norm=p_norm, block_b=8)
    jax.block_until_ready(scores)

    # Pure-JAX reference check (matches the PyTorch forward).
    e_h = jnp.take(params.emb_e, h, axis=0)
    e_r = jnp.take(params.emb_rel, rel, axis=0)
    e_t = jnp.take(params.emb_e, t, axis=0)
    x = e_h @ params.wt + e_r - e_t @ params.wt
    ref = jnp.sum(jnp.abs(x) ** p_norm, axis=-1)
    assert scores.shape == (batch,)
    assert jnp.allclose(scores, ref, rtol=1e-5, atol=1e-5)

    print("KERNEL_OK")
</pallas_src>

<mosaic_0001>
module attributes {stable_mosaic.version = 11 : i64} {
  func.func @_transr_kernel(%arg0: i32, %arg1: memref<8x32xf32, #tpu.memory_space<vmem>>, %arg2: memref<8x32xf32, #tpu.memory_space<vmem>>, %arg3: memref<8x16xf32, #tpu.memory_space<vmem>>, %arg4: memref<32x16xf32, #tpu.memory_space<vmem>>, %arg5: memref<8x1xf32, #tpu.memory_space<vmem>>) attributes {dimension_semantics = [#tpu.dimension_semantics<parallel>], iteration_bounds = array<i64: 2>, scalar_prefetch = 0 : i64, scratch_operands = 0 : i64, tpu.core_type = #tpu.core_type<tc>, window_params = [{transform_indices = @transform_0, window_bounds = array<i64: 8, 32>}, {transform_indices = @transform_1, window_bounds = array<i64: 8, 32>}, {transform_indices = @transform_2, window_bounds = array<i64: 8, 16>}, {pipeline_mode = #tpu.pipeline_mode<synchronous>, transform_indices = @transform_3, window_bounds = array<i64: 32, 16>}, {transform_indices = @transform_4, window_bounds = array<i64: 8, 1>}]} {
    %c0 = arith.constant 0 : index
    %c0_0 = arith.constant 0 : index
    %0 = vector.load %arg1[%c0, %c0_0] : memref<8x32xf32, #tpu.memory_space<vmem>>, vector<8x32xf32>
    %c0_1 = arith.constant 0 : index
    %c0_2 = arith.constant 0 : index
    %1 = vector.load %arg2[%c0_1, %c0_2] : memref<8x32xf32, #tpu.memory_space<vmem>>, vector<8x32xf32>
    %2 = arith.subf %0, %1 : vector<8x32xf32>
    %c0_3 = arith.constant 0 : index
    %c0_4 = arith.constant 0 : index
    %3 = vector.load %arg4[%c0_3, %c0_4] : memref<32x16xf32, #tpu.memory_space<vmem>>, vector<32x16xf32>
    %cst = arith.constant dense<0.000000e+00> : vector<8x16xf32>
    %4 = tpu.matmul %2, %3, %cst {dimension_numbers = #tpu.dot_dimension_numbers<[1], [0], [0], [1], [0, 0, 1, 1], [], []>} : vector<8x32xf32>, vector<32x16xf32>, vector<8x16xf32> -> vector<8x16xf32>
    %c0_5 = arith.constant 0 : index
    %c0_6 = arith.constant 0 : index
    %5 = vector.load %arg3[%c0_5, %c0_6] : memref<8x16xf32, #tpu.memory_space<vmem>>, vector<8x16xf32>
    %6 = arith.addf %4, %5 : vector<8x16xf32>
    %7 = arith.mulf %6, %6 : vector<8x16xf32>
    %cst_7 = arith.constant dense<0.000000e+00> : vector<8xf32>
    %8 = vector.multi_reduction <add>, %7, %cst_7 [1] : vector<8x16xf32> to vector<8xf32>
    %9 = vector.shape_cast %8 : vector<8xf32> to vector<8x1xf32>
    %c0_8 = arith.constant 0 : index
    %c0_9 = arith.constant 0 : index
    %10 = vector.load %arg5[%c0_8, %c0_9] : memref<8x1xf32, #tpu.memory_space<vmem>>, vector<8x1xf32>
    tpu.vector_store %arg5[%c0_8, %c0_9], %9 {strides = array<i32>} : memref<8x1xf32, #tpu.memory_space<vmem>>, vector<8x1xf32>,
    return
  }
  func.func @transform_0(%arg0: i32) -> (i32, i32) {
    %c0_i32 = arith.constant 0 : i32
    %c0_i32_0 = arith.constant 0 : i32
    return %arg0, %c0_i32 : i32, i32
  }
  func.func @transform_1(%arg0: i32) -> (i32, i32) {
    %c0_i32 = arith.constant 0 : i32
    %c0_i32_0 = arith.constant 0 : i32
    return %arg0, %c0_i32 : i32, i32
  }
  func.func @transform_2(%arg0: i32) -> (i32, i32) {
    %c0_i32 = arith.constant 0 : i32
    %c0_i32_0 = arith.constant 0 : i32
    return %arg0, %c0_i32 : i32, i32
  }
  func.func @transform_3(%arg0: i32) -> (i32, i32) {
    %c0_i32 = arith.constant 0 : i32
    %c0_i32_0 = arith.constant 0 : i32
    %c0_i32_1 = arith.constant 0 : i32
    return %c0_i32, %c0_i32_0 : i32, i32
  }
  func.func @transform_4(%arg0: i32) -> (i32, i32) {
    %c0_i32 = arith.constant 0 : i32
    %c0_i32_0 = arith.constant 0 : i32
    return %arg0, %c0_i32 : i32, i32
  }
}

</mosaic_0001>

<bundles_post_ra>
// kernel: transr_forward.1
= control target key start
LH: loop header
LB: loop body
LE: loop exit
PB: predicated region body
PF: predicated region fallthrough
CT: control target
= control target key end

     0   :  { %s396_s15 = smov 0   ;;  %s431_s0 = inlined_call_operand.vmem [shape: f32[16,32], index: 0, kind: input, shape index: {}]   ;;  %s432_s1 = inlined_call_operand.vmem [shape: f32[16,32], index: 1, kind: input, shape index: {}]   ;;  %s433_s2 = inlined_call_operand.vmem [shape: f32[16,16], index: 2, kind: input, shape index: {}]   ;;  %s434_s3 = inlined_call_operand.vmem [shape: f32[32,16], index: 3, kind: input, shape index: {}]   ;;  %s435_s4 = inlined_call_operand.vmem [shape: f32[16,1], index: 4, kind: output, shape index: {}]  }
   0x1 LB: > { %s343_s16 = sadd.s32 4294967295, %s369_s15   ;;  %p347_p0 = scmp.ge.s32.totalorder %s369_s15, 1  ;;  %s369_s15 = sphi %s396_s15, %s14_s15  }
   0x2   : > { %p179_p1 = scmp.lt.s32.totalorder %s369_s15, 3 }
   0x4   : > { %p180_p2 = pnand %p347_p0, %p179_p1 }
   0x5   : > { %p211_p3 = scmp.lt.s32.totalorder (!%p180_p2), %s343_s16, 1 }
   0x6   : > { %183 = sbr.rel (%p180_p2) target bundleno = 267 (0x10b), region = 36 }
   0xb   : > { %v233_v0 = vld [vmem:[%s434_s3 + $0x18] sm:$0xff]  ;;  %v232_v1 = vld [vmem:[%s434_s3 + $0x10] sm:$0xff]  ;;  %v231_v2 = vld [vmem:[%s434_s3 + $0x8] sm:$0xff]  ;;  %s437_s16 = smov (!%p211_p3, %s343_s16), 1  ;;  %vm235_vm0 = vcmask 261120   ;;  %vm260_vm1 = vcmask 130048  }
   0xc   : > { %251 = vmatpush.msra.mxu0 %v233_v0  ;;  %v230_v3 = vld [vmem:[%s434_s3] sm:$0xff]  ;;  %s348_s25 = sshll.u32 %s437_s16, 3  ;;  %vm264_vm2 = vcmask 7168  }
   0xd   : > { %s214_s28 = scalar_lea.vmem %s431_s0, %s348_s25  ;;  %s218_s5 = scalar_lea.vmem %s432_s1, %s348_s25 }
   0xe   : > { %252 = vmatpush.msra.mxu0 %v232_v1  ;;  %v227_v4 = vld [vmem:[%s214_s28] sm:$0xff]  ;;  %s222_s8 = scalar_lea.vmem %s433_s2, %s348_s25  ;;  %s226_s11 = scalar_lea.vmem %s435_s4, %s348_s25 }
   0xf   : > { %v228_v5 = vld [vmem:[%s218_s5] sm:$0xff] }
  0x10   : > { %253 = vmatpush.msra.mxu0 %v231_v2  ;;  %v229_v6 = vsub.f32 %v227_v4, %v228_v5  ;;  %v234_v7 = vld [vmem:[%s222_s8] sm:$0xff] }
  0x12   : > { %254 = vmatpush.msra.mxu0 %v230_v3 }
  0x13   : > { %352 = vmatmul.msk.f32.vlgmr.msra.gmra.mxu0 %vm235_vm0, %v229_v6 }
  0x90   : > { %v256_v8 = vpop.f32.mrf.mxu0 }
  0x91   : > { %v257_v9 = vadd.f32 %v256_v8, %v234_v7 }
  0x93   : > { %v259_v10 = vmul.f32 %v257_v9, %v257_v9 }
  0x95   : > { %v261_v11 = vsel %vm260_vm1, %v259_v10, 0.0 }
  0x96   : > { %262 = vadd.xlane.f32.xlu0 %v261_v11 }
 0x109   : > { %v263_v12 = vpop.xlane.xlu0 %262 }
 0x10a   : > { %265 = vst.msk [vmem:[%s226_s11] sm:$0xff] %vm264_vm2, %v263_v12 }
 0x10b PF: > { %s14_s15 = sadd.s32 1, %s369_s15  }
 0x10c   : > { %p11_p4 = scmp.ge.s32.totalorder %s14_s15, 4  }
 0x10e   :  { %13 = sbr.rel (!%p11_p4) target bundleno = 1 (0x1), region = 72 }

</bundles_post_ra>
